<compile_context>
chip_gen: v7x
topology: tpu7x:2x2x1
jax: 0.10.0
libtpu: 0.0.40
codegen_flags: <defaults>
</compile_context>

<pallas_src>
import functools

import jax
import jax.numpy as jnp
from jax.experimental import pallas as pl
from jax.experimental.pallas import tpu as pltpu


# ---------------------------------------------------------------------------
# Kernels
# ---------------------------------------------------------------------------

def _layernorm_kernel(x_ref, gamma_ref, beta_ref, o_ref, *, eps, features):
    """Generic path: one logical row per tile row (features on the lane axis)."""
    x = x_ref[...].astype(jnp.float32)

    # Two-pass mean/variance: the tile is resident in VMEM, the extra VALU
    # pass is hidden under the HBM DMA, and it avoids E[x^2]-mean^2
    # cancellation for large-mean inputs.
    mean = jnp.sum(x, axis=-1, keepdims=True) * jnp.float32(1.0 / features)
    diff = x - mean
    var = jnp.sum(diff * diff, axis=-1, keepdims=True) * jnp.float32(
        1.0 / (features - 1))  # unbiased (torch.Tensor.std, ddof=1)

    # Per-row reciprocal of a (rows, 1) column, then multiplies (no full-tile
    # divide).  approx=False keeps the strict 1e-5 tolerance.
    inv = pl.reciprocal(jnp.sqrt(var) + jnp.float32(eps), approx=False)

    gamma = gamma_ref[...].astype(jnp.float32)
    beta = beta_ref[...].astype(jnp.float32)
    o_ref[...] = (diff * inv * gamma + beta).astype(o_ref.dtype)


def _layernorm_packed_kernel(x_ref, gamma_ref, beta_ref, q_ref, o_ref, *,
                             eps, features):
    """Lane-packed path: each tile row holds k = 128 // features logical rows.

    q_ref is a (128, 128) bf16 block-diagonal 0/1 matrix (ones within each
    `features`-wide segment), so x @ q gives every lane the sum over its own
    segment, already broadcast -- reductions ride the otherwise-idle MXU.
    """
    x = x_ref[...].astype(jnp.float32)      # (block_rows, 128)
    q = q_ref[...]                          # (128, 128) bf16, exact 0/1

    def seg_sum(v):
        # Exact-f32 per-segment sum: split v into three bf16 components
        # (8+8+8 = 24 mantissa bits); products with 0/1 are exact and
        # accumulate in f32 on the MXU, so the result matches a plain f32
        # summation to ~1 ulp without relying on any matmul precision flags.
        hi = v.astype(jnp.bfloat16)
        r = v - hi.astype(jnp.float32)
        mid = r.astype(jnp.bfloat16)
        lo = (r - mid.astype(jnp.float32)).astype(jnp.bfloat16)
        out = jnp.dot(hi, q, preferred_element_type=jnp.float32)
        out = out + jnp.dot(mid, q, preferred_element_type=jnp.float32)
        out = out + jnp.dot(lo, q, preferred_element_type=jnp.float32)
        return out

    mean = seg_sum(x) * jnp.float32(1.0 / features)
    diff = x - mean
    var = seg_sum(diff * diff) * jnp.float32(1.0 / (features - 1))
    inv = pl.reciprocal(jnp.sqrt(var) + jnp.float32(eps), approx=False)

    gamma = gamma_ref[...].astype(jnp.float32)  # gamma tiled k times -> (1, 128)
    beta = beta_ref[...].astype(jnp.float32)
    o_ref[...] = (diff * inv * gamma + beta).astype(o_ref.dtype)


# ---------------------------------------------------------------------------
# Block sizing / hardware plumbing
# ---------------------------------------------------------------------------

def _round_up(v, m):
    return ((v + m - 1) // m) * m


def _device_kind():
    try:
        return jax.devices()[0].device_kind.lower()
    except Exception:
        return ""


def _vmem_capacity_bytes():
    try:
        cap = getattr(pltpu.get_tpu_info(), "vmem_capacity_bytes", None)
        if cap:
            return int(cap)
    except Exception:
        pass
    # Fallback heuristic: v7x has 64 MiB per TensorCore, earlier parts 128 MiB.
    return (64 if "7" in _device_kind() else 128) * 1024 * 1024


def _vmem_budgets():
    """(block-data byte budget, vmem_limit_bytes) for the current generation."""
    cap = _vmem_capacity_bytes()
    if cap >= 100 * 1024 * 1024:
        # v5e / v6e: 128 MiB physical per core -> big blocks, generous limit.
        return 48 * 1024 * 1024, 72 * 1024 * 1024
    # v7x: 64 MiB per TensorCore -> keep headroom for Mosaic internal scratch.
    return 32 * 1024 * 1024, 48 * 1024 * 1024


def _dim_semantics(grid_rows):
    # v7x has two TensorCores per chip and this kernel is DMA-bound, so
    # explicitly request CORE_PARALLEL there (plain "parallel" barely changes
    # codegen).  Single-core parts keep "parallel".
    if "7" in _device_kind() and grid_rows >= 2:
        return (pltpu.CORE_PARALLEL,)
    return ("parallel",)


_PIPELINE_MIN_BLOCK_ROWS = 4096  # floor for the "keep >=~4 grid steps" cap


def _pick_block_rows(rows, features, dtype, block_budget_bytes):
    itemsize = int(jnp.dtype(dtype).itemsize)
    # Sub-32-bit dtypes pack along sublanes (bf16 -> 16, int8/fp8 -> 32): keep
    # row blocks a multiple of the packed sublane count (unmasked ld/st).
    sublane = 8 * max(1, 4 // max(itemsize, 1))
    # VMEM tiles pad the lane axis to 128, so budget with the padded row width
    # (essential for narrow features now that the fixed row cap is gone).
    lanes = _round_up(features, 128)
    in_row = lanes * itemsize          # one buffered copy of an in/out row
    f32_row = lanes * 4                # one full-tile f32 intermediate row
    # 2x input + 2x output (double-buffered) + ~4 full-tile f32 temporaries
    # (f32 upcast, diff, bf16-split scratch, store staging).
    bytes_per_row = 4 * in_row + 4 * f32_row

    budget_rows = (block_budget_bytes // bytes_per_row // sublane) * sublane
    budget_rows = max(budget_rows, sublane)
    # Mild cap so medium-sized inputs still get a few pipelined grid steps
    # (in-DMA / compute / out-DMA overlap) without ever dropping blocks below
    # the multi-MiB range where the ~0.35us per-step overhead is noise.
    pipeline_cap = max(_round_up((rows + 3) // 4, sublane),
                       _PIPELINE_MIN_BLOCK_ROWS)
    block_rows = min(budget_rows, pipeline_cap, _round_up(rows, sublane))
    return max(block_rows, sublane)


# ---------------------------------------------------------------------------
# Public entry point
# ---------------------------------------------------------------------------

def layer_norm(x, gamma, beta, eps=1e-6):
    """LayerNorm over the last axis of x (Universal Transformer semantics)."""
    orig_shape = x.shape
    features = orig_shape[-1]
    assert features >= 2, "unbiased std (ddof=1) requires features >= 2"

    rows = 1
    for d in orig_shape[:-1]:
        rows *= d

    block_budget, vmem_limit = _vmem_budgets()

    # Lane-dense packing: fold k = 128 // features rows into the lane axis
    # when features < 128 divides 128 and the row count cooperates.  The
    # wrapper-side reshape is free (row-major contiguity).
    packed = (features < 128 and 128 % features == 0 and rows > 0
              and rows % (128 // features) == 0)

    if packed:
        k = 128 // features
        rows2, feat2 = rows // k, 128
        x2 = x.reshape(rows2, feat2)
        gamma2 = jnp.tile(gamma.reshape(-1), k).reshape(1, feat2)
        beta2 = jnp.tile(beta.reshape(-1), k).reshape(1, feat2)
        # Block-diagonal 0/1 segment matrix (exact in bf16).
        q = jnp.kron(jnp.eye(k, dtype=jnp.float32),
                     jnp.ones((features, features), dtype=jnp.float32)
                     ).astype(jnp.bfloat16)
        extra_inputs = (q,)
        extra_specs = [pl.BlockSpec((feat2, feat2), lambda i: (0, 0))]
        kernel = functools.partial(_layernorm_packed_kernel, eps=eps,
                                   features=features)
    else:
        rows2, feat2 = rows, features
        x2 = x.reshape(rows2, feat2)
        gamma2 = gamma.reshape(1, feat2)
        beta2 = beta.reshape(1, feat2)
        extra_inputs = ()
        extra_specs = []
        kernel = functools.partial(_layernorm_kernel, eps=eps,
                                   features=features)

    block_rows = _pick_block_rows(rows2, feat2, x.dtype, block_budget)
    # cdiv grid: the trailing edge block may read padded/garbage rows; every
    # row is independent and out-of-range rows are dropped on writeback, so no
    # mask is needed (do not "fix" this).
    grid = (pl.cdiv(rows2, block_rows),)

    out2 = pl.pallas_call(
        kernel,
        out_shape=jax.ShapeDtypeStruct((rows2, feat2), x.dtype),
        grid_spec=pltpu.PrefetchScalarGridSpec(
            num_scalar_prefetch=0,
            grid=grid,
            in_specs=[
                pl.BlockSpec((block_rows, feat2), lambda i: (i, 0)),
                pl.BlockSpec((1, feat2), lambda i: (0, 0)),
                pl.BlockSpec((1, feat2), lambda i: (0, 0)),
                *extra_specs,
            ],
            out_specs=pl.BlockSpec((block_rows, feat2), lambda i: (i, 0)),
        ),
        compiler_params=pltpu.CompilerParams(
            dimension_semantics=_dim_semantics(grid[0]),
            vmem_limit_bytes=vmem_limit,
        ),
    )(x2, gamma2, beta2, *extra_inputs)

    return out2.reshape(orig_shape)


def layer_norm_ref(x, gamma, beta, eps=1e-6):
    """Pure-JAX reference matching the PyTorch module semantics."""
    xf = x.astype(jnp.float32)
    mean = jnp.mean(xf, axis=-1, keepdims=True)
    diff = xf - mean
    var = jnp.sum(diff * diff, axis=-1, keepdims=True) / (x.shape[-1] - 1)
    std = jnp.sqrt(var)
    out = gamma.astype(jnp.float32) * diff / (std + eps) + beta.astype(jnp.float32)
    return out.astype(x.dtype)


if __name__ == "__main__":
    # Shapes implied by the Universal Transformer module: (batch, seq, hidden),
    # normalized over hidden.
    batch, seq, hidden = 2, 8, 32
    gamma = jnp.ones((hidden,), dtype=jnp.float32)
    beta = jnp.zeros((hidden,), dtype=jnp.float32)
    x = jax.random.normal(jax.random.PRNGKey(0), (batch, seq, hidden),
                          dtype=jnp.float32)

    # Case 1: features=32 -> lane-packed path (k=4, MXU segmented reductions).
    out = jax.block_until_ready(layer_norm(x, gamma, beta, eps=1e-6))
    ref = layer_norm_ref(x, gamma, beta, eps=1e-6)
    assert out.shape == x.shape
    assert jnp.allclose(out, ref, atol=1e-5, rtol=1e-5), "mismatch (packed path)"

    # Case 2: lane-dense features (128) and rows=21 (not a multiple of the
    # sublane-rounded block) -> unpacked path with a padded edge block.
    b2, s2, h2 = 3, 7, 128
    g2 = jnp.ones((h2,), dtype=jnp.float32)
    be2 = jnp.zeros((h2,), dtype=jnp.float32)
    xb = jax.random.normal(jax.random.PRNGKey(1), (b2, s2, h2), dtype=jnp.float32)
    out_b = jax.block_until_ready(layer_norm(xb, g2, be2, eps=1e-6))
    ref_b = layer_norm_ref(xb, g2, be2, eps=1e-6)
    assert jnp.allclose(out_b, ref_b, atol=1e-5, rtol=1e-5), "mismatch (wide path)"

    # Case 3: narrow features but rows (7) not divisible by 128//features ->
    # exercises the unpacked fallback with masked sub-128 stores.
    b3, s3, h3 = 1, 7, 32
    g3 = jnp.ones((h3,), dtype=jnp.float32)
    be3 = jnp.zeros((h3,), dtype=jnp.float32)
    xc = jax.random.normal(jax.random.PRNGKey(2), (b3, s3, h3), dtype=jnp.float32)
    out_c = jax.block_until_ready(layer_norm(xc, g3, be3, eps=1e-6))
    ref_c = layer_norm_ref(xc, g3, be3, eps=1e-6)
    assert jnp.allclose(out_c, ref_c, atol=1e-5, rtol=1e-5), "mismatch (fallback path)"

    print("KERNEL_OK")
</pallas_src>

<mosaic_0001>
module attributes {stable_mosaic.version = 11 : i64} {
  func.func @_layernorm_packed_kernel(%arg0: i32, %arg1: memref<8x128xf32, #tpu.memory_space<vmem>>, %arg2: memref<1x128xf32, #tpu.memory_space<vmem>>, %arg3: memref<1x128xf32, #tpu.memory_space<vmem>>, %arg4: memref<128x128xbf16, #tpu.memory_space<vmem>>, %arg5: memref<8x128xf32, #tpu.memory_space<vmem>>) attributes {dimension_semantics = [#tpu.dimension_semantics<parallel>], iteration_bounds = array<i64: 1>, scalar_prefetch = 0 : i64, scratch_operands = 0 : i64, tpu.core_type = #tpu.core_type<tc>, window_params = [{transform_indices = @transform_0, window_bounds = array<i64: 8, 128>}, {pipeline_mode = #tpu.pipeline_mode<synchronous>, transform_indices = @transform_1, window_bounds = array<i64: 1, 128>}, {pipeline_mode = #tpu.pipeline_mode<synchronous>, transform_indices = @transform_2, window_bounds = array<i64: 1, 128>}, {pipeline_mode = #tpu.pipeline_mode<synchronous>, transform_indices = @transform_3, window_bounds = array<i64: 128, 128>}, {transform_indices = @transform_4, window_bounds = array<i64: 8, 128>}]} {
    %c0 = arith.constant 0 : index
    %c0_0 = arith.constant 0 : index
    %0 = vector.load %arg1[%c0, %c0_0] : memref<8x128xf32, #tpu.memory_space<vmem>>, vector<8x128xf32>
    %c0_1 = arith.constant 0 : index
    %c0_2 = arith.constant 0 : index
    %1 = vector.load %arg4[%c0_1, %c0_2] : memref<128x128xbf16, #tpu.memory_space<vmem>>, vector<128x128xbf16>
    %2 = arith.truncf %0 : vector<8x128xf32> to vector<8x128xbf16>
    %3 = arith.extf %2 : vector<8x128xbf16> to vector<8x128xf32>
    %4 = arith.subf %0, %3 : vector<8x128xf32>
    %5 = arith.truncf %4 : vector<8x128xf32> to vector<8x128xbf16>
    %6 = arith.extf %5 : vector<8x128xbf16> to vector<8x128xf32>
    %7 = arith.subf %4, %6 : vector<8x128xf32>
    %8 = arith.truncf %7 : vector<8x128xf32> to vector<8x128xbf16>
    %cst = arith.constant dense<0.000000e+00> : vector<8x128xf32>
    %9 = tpu.matmul %2, %1, %cst {dimension_numbers = #tpu.dot_dimension_numbers<[1], [0], [0], [1], [0, 0, 1, 1], [], []>} : vector<8x128xbf16>, vector<128x128xbf16>, vector<8x128xf32> -> vector<8x128xf32>
    %cst_3 = arith.constant dense<0.000000e+00> : vector<8x128xf32>
    %10 = tpu.matmul %5, %1, %cst_3 {dimension_numbers = #tpu.dot_dimension_numbers<[1], [0], [0], [1], [0, 0, 1, 1], [], []>} : vector<8x128xbf16>, vector<128x128xbf16>, vector<8x128xf32> -> vector<8x128xf32>
    %11 = arith.addf %9, %10 : vector<8x128xf32>
    %cst_4 = arith.constant dense<0.000000e+00> : vector<8x128xf32>
    %12 = tpu.matmul %8, %1, %cst_4 {dimension_numbers = #tpu.dot_dimension_numbers<[1], [0], [0], [1], [0, 0, 1, 1], [], []>} : vector<8x128xbf16>, vector<128x128xbf16>, vector<8x128xf32> -> vector<8x128xf32>
    %13 = arith.addf %11, %12 : vector<8x128xf32>
    %cst_5 = arith.constant 3.125000e-02 : f32
    %14 = vector.broadcast %cst_5 : f32 to vector<8x128xf32>
    %15 = arith.mulf %13, %14 : vector<8x128xf32>
    %16 = arith.subf %0, %15 : vector<8x128xf32>
    %17 = arith.mulf %16, %16 : vector<8x128xf32>
    %18 = arith.truncf %17 : vector<8x128xf32> to vector<8x128xbf16>
    %19 = arith.extf %18 : vector<8x128xbf16> to vector<8x128xf32>
    %20 = arith.subf %17, %19 : vector<8x128xf32>
    %21 = arith.truncf %20 : vector<8x128xf32> to vector<8x128xbf16>
    %22 = arith.extf %21 : vector<8x128xbf16> to vector<8x128xf32>
    %23 = arith.subf %20, %22 : vector<8x128xf32>
    %24 = arith.truncf %23 : vector<8x128xf32> to vector<8x128xbf16>
    %cst_6 = arith.constant dense<0.000000e+00> : vector<8x128xf32>
    %25 = tpu.matmul %18, %1, %cst_6 {dimension_numbers = #tpu.dot_dimension_numbers<[1], [0], [0], [1], [0, 0, 1, 1], [], []>} : vector<8x128xbf16>, vector<128x128xbf16>, vector<8x128xf32> -> vector<8x128xf32>
    %cst_7 = arith.constant dense<0.000000e+00> : vector<8x128xf32>
    %26 = tpu.matmul %21, %1, %cst_7 {dimension_numbers = #tpu.dot_dimension_numbers<[1], [0], [0], [1], [0, 0, 1, 1], [], []>} : vector<8x128xbf16>, vector<128x128xbf16>, vector<8x128xf32> -> vector<8x128xf32>
    %27 = arith.addf %25, %26 : vector<8x128xf32>
    %cst_8 = arith.constant dense<0.000000e+00> : vector<8x128xf32>
    %28 = tpu.matmul %24, %1, %cst_8 {dimension_numbers = #tpu.dot_dimension_numbers<[1], [0], [0], [1], [0, 0, 1, 1], [], []>} : vector<8x128xbf16>, vector<128x128xbf16>, vector<8x128xf32> -> vector<8x128xf32>
    %29 = arith.addf %27, %28 : vector<8x128xf32>
    %cst_9 = arith.constant 0.0322580636 : f32
    %30 = vector.broadcast %cst_9 : f32 to vector<8x128xf32>
    %31 = arith.mulf %29, %30 : vector<8x128xf32>
    %32 = math.sqrt %31 : vector<8x128xf32>
    %cst_10 = arith.constant 9.99999997E-7 : f32
    %33 = vector.broadcast %cst_10 : f32 to vector<8x128xf32>
    %34 = arith.addf %32, %33 : vector<8x128xf32>
    %35 = tpu.reciprocal %34 : vector<8x128xf32> -> vector<8x128xf32>
    %c0_11 = arith.constant 0 : index
    %c0_12 = arith.constant 0 : index
    %36 = vector.load %arg2[%c0_11, %c0_12] : memref<1x128xf32, #tpu.memory_space<vmem>>, vector<1x128xf32>
    %c0_13 = arith.constant 0 : index
    %c0_14 = arith.constant 0 : index
    %37 = vector.load %arg3[%c0_13, %c0_14] : memref<1x128xf32, #tpu.memory_space<vmem>>, vector<1x128xf32>
    %38 = arith.mulf %16, %35 : vector<8x128xf32>
    %39 = vector.broadcast %36 : vector<1x128xf32> to vector<8x128xf32>
    %40 = arith.mulf %38, %39 : vector<8x128xf32>
    %41 = vector.broadcast %37 : vector<1x128xf32> to vector<8x128xf32>
    %42 = arith.addf %40, %41 : vector<8x128xf32>
    %c0_15 = arith.constant 0 : index
    %c0_16 = arith.constant 0 : index
    %43 = vector.load %arg5[%c0_15, %c0_16] : memref<8x128xf32, #tpu.memory_space<vmem>>, vector<8x128xf32>
    tpu.vector_store %arg5[%c0_15, %c0_16], %42 {strides = array<i32>} : memref<8x128xf32, #tpu.memory_space<vmem>>, vector<8x128xf32>,
    return
  }
  func.func @transform_0(%arg0: i32) -> (i32, i32) {
    %c0_i32 = arith.constant 0 : i32
    %c0_i32_0 = arith.constant 0 : i32
    return %arg0, %c0_i32 : i32, i32
  }
  func.func @transform_1(%arg0: i32) -> (i32, i32) {
    %c0_i32 = arith.constant 0 : i32
    %c0_i32_0 = arith.constant 0 : i32
    %c0_i32_1 = arith.constant 0 : i32
    return %c0_i32, %c0_i32_0 : i32, i32
  }
  func.func @transform_2(%arg0: i32) -> (i32, i32) {
    %c0_i32 = arith.constant 0 : i32
    %c0_i32_0 = arith.constant 0 : i32
    %c0_i32_1 = arith.constant 0 : i32
    return %c0_i32, %c0_i32_0 : i32, i32
  }
  func.func @transform_3(%arg0: i32) -> (i32, i32) {
    %c0_i32 = arith.constant 0 : i32
    %c0_i32_0 = arith.constant 0 : i32
    %c0_i32_1 = arith.constant 0 : i32
    return %c0_i32, %c0_i32_0 : i32, i32
  }
  func.func @transform_4(%arg0: i32) -> (i32, i32) {
    %c0_i32 = arith.constant 0 : i32
    %c0_i32_0 = arith.constant 0 : i32
    return %arg0, %c0_i32 : i32, i32
  }
}

</mosaic_0001>

<bundles_post_ra>
// kernel: tpu_custom_call.1
= control target key start
LH: loop header
LB: loop body
LE: loop exit
PB: predicated region body
PF: predicated region fallthrough
CT: control target
= control target key end

     0   :  { %9 = vsyncpa [#allocation3], 0  ;;  %s1033_s0 = inlined_call_operand.hbm [shape: f32[4,128], index: 0, kind: input, shape index: {}]   ;;  %s1034_s1 = inlined_call_operand.hbm [shape: f32[1,128], index: 1, kind: input, shape index: {}]   ;;  %s1035_s2 = inlined_call_operand.hbm [shape: f32[1,128], index: 2, kind: input, shape index: {}]   ;;  %s1036_s3 = inlined_call_operand.hbm [shape: bf16[128,128], index: 3, kind: input, shape index: {}]   ;;  %s1037_s4 = inlined_call_operand.hbm [shape: f32[4,128], index: 4, kind: output, shape index: {}]  }
   0x1   :  { %10 = vsyncpa [#allocation6], 0 }
   0x2   :  { %11 = vsyncpa [#allocation9], 0 }
   0x3   :  { %12 = vsyncpa [#allocation4], 0 }
   0x4   :  { %17 = vsyncadd [#allocation3], 64  ;;  %s780_s15 = smov [#allocation5]   ;;  %s781_s17 = smov [#allocation2]  }
   0x5   :  { %s31_s16 = sshll.u32 %s780_s15, 4  ;;  %s18_s18 = sshll.u32 %s781_s17, 4  ;;  %s32_s16 = int_to_ptr.vmem [resolvable:$true] %s31_s16  ;;  %s814_s18 = int_to_ptr.vmem [resolvable:$true] %s18_s18 }
   0x6   :  { %s662_s21 = scalar_lea.hbm %s1034_s1, 16 }
   0x7   :  { %p663_p0 = scmp.ne.s32.totalorder %s1034_s1, %s662_s21  ;;  %p666_p1 = scmp.lt.u32.totalorder %s662_s21, %s1034_s1 }
   0x9   :  { %p668_p2 = pnand %p666_p1, %p663_p0 }
   0xb   :  { %671 = shalt.err (!%p668_p2)
}
   0xc   :  { %s672_s26 = scalar_lea.vmem %s32_s16, 16  ;;  %s676_s27 = scalar_lea.vmem %s32_s16, 32 }
   0xd   :  { %p673_p3 = scmp.ne.s32.totalorder %s32_s16, %s672_s26  ;;  %p677_p4 = scmp.lt.s32.totalorder %s32_s16, %s32_s16 }
   0xe   :  { %p678_p5 = scmp.lt.s32.totalorder %s676_s27, %s672_s26 }
  0x10   :  { %p679_p6 = por %p678_p5, %p677_p4 }
  0x12   :  { %p680_p7 = pnand %p679_p6, %p673_p3 }
  0x14   :  { %683 = shalt.err (!%p680_p7)
}
  0x15   :  { %34 = dma.hbm_to_vmem [thread:$0]  %s1034_s1, 16, %s32_s16, [#allocation6]  }
  0x16   :  { %s684_s6 = scalar_lea.hbm %s1033_s0, 64 }
  0x17   :  { %p685_p8 = scmp.ne.s32.totalorder %s1033_s0, %s684_s6  ;;  %p688_p9 = scmp.lt.u32.totalorder %s684_s6, %s1033_s0 }
  0x19   :  { %p690_p10 = pnand %p688_p9, %p685_p8 }
  0x1b   :  { %693 = shalt.err (!%p690_p10)
}
  0x1c   :  { %s694_s11 = scalar_lea.vmem %s814_s18, 64  ;;  %s698_s1 = scalar_lea.vmem %s814_s18, 128 }
  0x1d   :  { %p695_p11 = scmp.ne.s32.totalorder %s814_s18, %s694_s11  ;;  %p699_p12 = scmp.lt.s32.totalorder %s814_s18, %s814_s18 }
  0x1e   :  { %p700_p13 = scmp.lt.s32.totalorder %s698_s1, %s694_s11 }
  0x20   :  { %p701_p0 = por %p700_p13, %p699_p12 }
  0x22   :  { %p702_p1 = pnand %p701_p0, %p695_p11 }
  0x24   :  { %705 = shalt.err (!%p702_p1)
}
  0x25   :  { %s782_s12 = smov 64   ;;  %s783_s13 = smov 4  }
  0x26   :  { %24 = dma.hbm_to_vmem [thread:$0]  %s1033_s0, 64, %s814_s18, [#allocation3], %s782_s12, %s782_s12, %s783_s13  }
  0x27   :  { %s784_s16 = smov [#allocation7]   ;;  %s785_s19 = smov [#allocation8]  }
  0x28   :  { %s41_s17 = sshll.u32 %s784_s16, 4  ;;  %s50_s20 = sshll.u32 %s785_s19, 4  ;;  %s42_s17 = int_to_ptr.vmem [resolvable:$true] %s41_s17  ;;  %s849_s20 = int_to_ptr.vmem [resolvable:$true] %s50_s20 }
  0x29   :  { %s706_s23 = scalar_lea.hbm %s1035_s2, 16 }
  0x2a   :  { %p707_p2 = scmp.ne.s32.totalorder %s1035_s2, %s706_s23  ;;  %p710_p3 = scmp.lt.u32.totalorder %s706_s23, %s1035_s2 }
  0x2c   :  { %p712_p4 = pnand %p710_p3, %p707_p2 }
  0x2e   :  { %715 = shalt.err (!%p712_p4)
}
  0x2f   :  { %s716_s0 = scalar_lea.vmem %s42_s17, 16  ;;  %s720_s18 = scalar_lea.vmem %s42_s17, 32 }
  0x30   :  { %p717_p5 = scmp.ne.s32.totalorder %s42_s17, %s716_s0  ;;  %p721_p6 = scmp.lt.s32.totalorder %s42_s17, %s42_s17 }
  0x31   :  { %p722_p7 = scmp.lt.s32.totalorder %s720_s18, %s716_s0 }
  0x33   :  { %p723_p8 = por %p722_p7, %p721_p6 }
  0x35   :  { %p724_p9 = pnand %p723_p8, %p717_p5 }
  0x37   :  { %727 = shalt.err (!%p724_p9)
}
  0x38   :  { %44 = dma.hbm_to_vmem [thread:$0]  %s1035_s2, 16, %s42_s17, [#allocation6]  }
  0x39   :  { %s728_s6 = scalar_lea.hbm %s1036_s3, 1024 }
  0x3a   :  { %p729_p10 = scmp.ne.s32.totalorder %s1036_s3, %s728_s6  ;;  %p732_p11 = scmp.lt.u32.totalorder %s728_s6, %s1036_s3 }
  0x3c   :  { %p734_p12 = pnand %p732_p11, %p729_p10 }
  0x3e   :  { %737 = shalt.err (!%p734_p12)
}
  0x3f   :  { %s738_s11 = scalar_lea.vmem %s849_s20, 1024  ;;  %p743_p0 = scmp.lt.s32.totalorder %s849_s20, %s849_s20 }
  0x40   :  { %p739_p13 = scmp.ne.s32.totalorder %s849_s20, %s738_s11  ;;  %p744_p1 = scmp.lt.s32.totalorder %s738_s11, %s738_s11 }
  0x42   :  { %p745_p2 = por %p744_p1, %p743_p0 }
  0x44   :  { %p746_p3 = pnand %p745_p2, %p739_p13 }
  0x46   :  { %749 = shalt.err (!%p746_p3)
}
  0x47   :  { %56 = dma.hbm_to_vmem [thread:$0]  %s1036_s3, 1024, %s849_s20, [#allocation9], %s782_s12, %s782_s12, %s783_s13  }
  0x48   :  { %772 = dma.done.wait [#allocation3], 128  }
  0x49   :  { %773 = vsyncadd [#allocation3], 4294967168 }
  0x4a   :  { %774 = dma.done.wait [#allocation6], 32  }
  0x4b   :  { %775 = vsyncadd [#allocation6], 4294967264 }
  0x4c   :  { %776 = dma.done.wait [#allocation9], 1024  }
  0x4d   :  { %777 = vsyncadd [#allocation9], 4294966272  ;;  %v786_v0 = vmov 0.0   ;;  %vm787_vm0 = vmmov 0   ;;  %v889_v1 = vld [vmem:[#allocation8] sm:$0xff]   ;;  %v892_v2 = vld [vmem:[#allocation8 + $0x8] sm:$0xff]  }
  0x4e   :  { %505 = vmatprep.subr.bf16.mxu0 %v786_v0  ;;  %521 = vmatprep.mubr.msk.bf16.mxu0 %vm787_vm0, %v786_v0  ;;  %v898_v3 = vld [vmem:[#allocation8 + $0x10] sm:$0xff]   ;;  %v904_v4 = vld [vmem:[#allocation8 + $0x18] sm:$0xff]   ;;  %v910_v5 = vld [vmem:[#allocation8 + $0x20] sm:$0xff]  }
  0x4f   :  { %565 = vmatprep.subr.bf16.mxu1 %v786_v0  ;;  %581 = vmatprep.mubr.msk.bf16.mxu1 %vm787_vm0, %v786_v0  ;;  %v912_v6 = vld [vmem:[#allocation2] sm:$0xff]  ;;  %v920_v8 = vld [vmem:[#allocation8 + $0x28] sm:$0xff]   ;;  %v449_v43 = vld [vmem:[#allocation5] ss:$0 sm:$0xff] }
  0x50   :  { %506 = vmatpush3.bf16.msra.mxu0 %v889_v1  ;;  %566 = vmatpush3.bf16.msra.mxu1 %v889_v1  ;;  %v87_v7 = vpack.c.bf16 %v912_v6, %v912_v6  ;;  %v926_v10 = vld [vmem:[#allocation8 + $0x30] sm:$0xff]   ;;  %v933_v12 = vld [vmem:[#allocation8 + $0x38] sm:$0xff]  }
  0x51   :  { %507 = vmatprep.subr.bf16.mxu0 %v786_v0  ;;  %567 = vmatprep.subr.bf16.mxu1 %v786_v0  ;;  %v450_v45 = vld [vmem:[#allocation7] ss:$0 sm:$0xff] }
  0x52   :  { %v88_v9 = vunpack.c.l.bf16 %v87_v7 }
  0x54   :  { %508 = vmatpush3.bf16.msra.mxu0 %v892_v2  ;;  %568 = vmatpush3.bf16.msra.mxu1 %v892_v2  ;;  %v89_v11 = vsub.f32 %v912_v6, %v88_v9 }
  0x55   :  { %509 = vmatprep.subr.bf16.mxu0 %v786_v0  ;;  %569 = vmatprep.subr.bf16.mxu1 %v786_v0 }
  0x56   :  { %v90_v13 = vpack.c.bf16 %v89_v11, %v89_v11 }
  0x58   :  { %510 = vmatpush3.bf16.msra.mxu0 %v898_v3  ;;  %570 = vmatpush3.bf16.msra.mxu1 %v898_v3  ;;  %v91_v14 = vunpack.c.l.bf16 %v90_v13 }
  0x59   :  { %511 = vmatprep.subr.bf16.mxu0 %v786_v0  ;;  %571 = vmatprep.subr.bf16.mxu1 %v786_v0 }
  0x5a   :  { %v92_v15 = vsub.f32 %v89_v11, %v91_v14 }
  0x5c   :  { %512 = vmatpush3.bf16.msra.mxu0 %v904_v4  ;;  %572 = vmatpush3.bf16.msra.mxu1 %v904_v4  ;;  %v93_v16 = vpack.c.bf16 %v92_v15, %v92_v15 }
  0x5d   :  { %513 = vmatprep.subr.bf16.mxu0 %v786_v0  ;;  %573 = vmatprep.subr.bf16.mxu1 %v786_v0 }
  0x60   :  { %514 = vmatpush3.bf16.msra.mxu0 %v910_v5  ;;  %574 = vmatpush3.bf16.msra.mxu1 %v910_v5 }
  0x61   :  { %515 = vmatprep.subr.bf16.mxu0 %v786_v0  ;;  %575 = vmatprep.subr.bf16.mxu1 %v786_v0 }
  0x64   :  { %516 = vmatpush3.bf16.msra.mxu0 %v920_v8  ;;  %576 = vmatpush3.bf16.msra.mxu1 %v920_v8 }
  0x65   :  { %517 = vmatprep.subr.bf16.mxu0 %v786_v0  ;;  %577 = vmatprep.subr.bf16.mxu1 %v786_v0 }
  0x68   :  { %518 = vmatpush3.bf16.msra.mxu0 %v926_v10  ;;  %578 = vmatpush3.bf16.msra.mxu1 %v926_v10 }
  0x69   :  { %519 = vmatprep.subr.bf16.mxu0 %v786_v0  ;;  %579 = vmatprep.subr.bf16.mxu1 %v786_v0 }
  0x6c   :  { %520 = vmatpush3.bf16.msra.mxu0 %v933_v12  ;;  %580 = vmatpush3.bf16.msra.mxu1 %v933_v12 }
  0x6d   :  { %525 = vmatprep.subr.bf16.mxu0 %v786_v0  ;;  %585 = vmatprep.subr.bf16.mxu1 %v786_v0 }
  0x6f   :  { %522 = vmatmul.mubr.bf16.vlgmr.msra.gmra.mrb[0].mxu0 %v90_v13 }
  0x70   :  { %526 = vmatpush3.bf16.msra.mxu0 %v889_v1  ;;  %541 = vmatprep.mubr.msk.bf16.mxu0 %vm787_vm0, %v786_v0 }
  0x71   :  { %527 = vmatprep.subr.bf16.mxu0 %v786_v0 }
  0x74   :  { %528 = vmatpush3.bf16.msra.mxu0 %v892_v2 }
  0x75   :  { %529 = vmatprep.subr.bf16.mxu0 %v786_v0 }
  0x78   :  { %530 = vmatpush3.bf16.msra.mxu0 %v898_v3 }
  0x79   :  { %531 = vmatprep.subr.bf16.mxu0 %v786_v0 }
  0x7c   :  { %532 = vmatpush3.bf16.msra.mxu0 %v904_v4 }
  0x7d   :  { %533 = vmatprep.subr.bf16.mxu0 %v786_v0 }
  0x80   :  { %534 = vmatpush3.bf16.msra.mxu0 %v910_v5 }
  0x81   :  { %535 = vmatprep.subr.bf16.mxu0 %v786_v0 }
  0x84   :  { %536 = vmatpush3.bf16.msra.mxu0 %v920_v8 }
  0x85   :  { %537 = vmatprep.subr.bf16.mxu0 %v786_v0 }
  0x88   :  { %538 = vmatpush3.bf16.msra.mxu0 %v926_v10 }
  0x89   :  { %539 = vmatprep.subr.bf16.mxu0 %v786_v0 }
  0x8c   :  { %540 = vmatpush3.bf16.msra.mxu0 %v933_v12 }
  0x8d   :  { %545 = vmatprep.subr.bf16.mxu0 %v786_v0 }
  0x8f   :  { %542 = vmatmul.mubr.bf16.vlgmr.msra.gmra.mrb[0].mxu0 %v87_v7 }
  0x90   :  { %546 = vmatpush3.bf16.msra.mxu0 %v889_v1  ;;  %561 = vmatprep.mubr.msk.bf16.mxu0 %vm787_vm0, %v786_v0 }
  0x91   :  { %547 = vmatprep.subr.bf16.mxu0 %v786_v0 }
  0x94   :  { %548 = vmatpush3.bf16.msra.mxu0 %v892_v2 }
  0x95   :  { %549 = vmatprep.subr.bf16.mxu0 %v786_v0 }
  0x98   :  { %550 = vmatpush3.bf16.msra.mxu0 %v898_v3 }
  0x99   :  { %551 = vmatprep.subr.bf16.mxu0 %v786_v0 }
  0x9c   :  { %552 = vmatpush3.bf16.msra.mxu0 %v904_v4 }
  0x9d   :  { %553 = vmatprep.subr.bf16.mxu0 %v786_v0 }
  0xa0   :  { %554 = vmatpush3.bf16.msra.mxu0 %v910_v5 }
  0xa1   :  { %555 = vmatprep.subr.bf16.mxu0 %v786_v0 }
  0xa4   :  { %556 = vmatpush3.bf16.msra.mxu0 %v920_v8 }
  0xa5   :  { %557 = vmatprep.subr.bf16.mxu0 %v786_v0 }
  0xa8   :  { %558 = vmatpush3.bf16.msra.mxu0 %v926_v10 }
  0xa9   :  { %559 = vmatprep.subr.bf16.mxu0 %v786_v0 }
  0xac   :  { %560 = vmatpush3.bf16.msra.mxu0 %v933_v12 }
  0xaf   :  { %562 = vmatmul.mubr.bf16.vlgmr.msra.gmra.mrb[0].mxu0 %v93_v16 }
 0x182   :  { %v256_v17 = vpop.f32.mrb[0].mxu0 }
 0x183   :  { %v263_v18 = vmul.f32 0.03125, %v256_v17  ;;  %v563_v19 = vpop.f32.mrb[1].mxu0 }
 0x184   :  { %v259_v20 = vpop.f32.mrb[2].mxu0 }
 0x185   :  { %v978_v21 = vsub.f32 %v912_v6, %v263_v18  ;;  %v564_v22 = vpop.f32.mrb[3].mxu0 }
 0x187   :  { %v265_v23 = vmul.f32 %v978_v21, %v978_v21 }
 0x189   :  { %v266_v24 = vpack.c.bf16 %v265_v23, %v265_v23 }
 0x18b   :  { %v267_v25 = vunpack.c.l.bf16 %v266_v24 }
 0x18d   :  { %v268_v26 = vsub.f32 %v265_v23, %v267_v25 }
 0x18f   :  { %v269_v27 = vpack.c.bf16 %v268_v26, %v268_v26 }
 0x191   :  { %582 = vmatmul.mubr.bf16.vlgmr.msra.gmra.mrb[0].mxu1 %v269_v27  ;;  %v270_v28 = vunpack.c.l.bf16 %v269_v27 }
 0x192   :  { %586 = vmatpush3.bf16.msra.mxu1 %v889_v1  ;;  %601 = vmatprep.mubr.msk.bf16.mxu1 %vm787_vm0, %v786_v0 }
 0x193   :  { %587 = vmatprep.subr.bf16.mxu1 %v786_v0  ;;  %v271_v29 = vsub.f32 %v268_v26, %v270_v28 }
 0x195   :  { %v272_v30 = vpack.c.bf16 %v271_v29, %v271_v29 }
 0x196   :  { %588 = vmatpush3.bf16.msra.mxu1 %v892_v2 }
 0x197   :  { %589 = vmatprep.subr.bf16.mxu1 %v786_v0 }
 0x19a   :  { %590 = vmatpush3.bf16.msra.mxu1 %v898_v3 }
 0x19b   :  { %591 = vmatprep.subr.bf16.mxu1 %v786_v0 }
 0x19e   :  { %592 = vmatpush3.bf16.msra.mxu1 %v904_v4 }
 0x19f   :  { %593 = vmatprep.subr.bf16.mxu1 %v786_v0 }
 0x1a2   :  { %594 = vmatpush3.bf16.msra.mxu1 %v910_v5 }
 0x1a3   :  { %595 = vmatprep.subr.bf16.mxu1 %v786_v0 }
 0x1a6   :  { %596 = vmatpush3.bf16.msra.mxu1 %v920_v8 }
 0x1a7   :  { %597 = vmatprep.subr.bf16.mxu1 %v786_v0 }
 0x1aa   :  { %598 = vmatpush3.bf16.msra.mxu1 %v926_v10 }
 0x1ab   :  { %599 = vmatprep.subr.bf16.mxu1 %v786_v0 }
 0x1ae   :  { %600 = vmatpush3.bf16.msra.mxu1 %v933_v12 }
 0x1af   :  { %605 = vmatprep.subr.bf16.mxu1 %v786_v0 }
 0x1b1   :  { %602 = vmatmul.mubr.bf16.vlgmr.msra.gmra.mrb[0].mxu1 %v266_v24 }
 0x1b2   :  { %606 = vmatpush3.bf16.msra.mxu1 %v889_v1  ;;  %621 = vmatprep.mubr.msk.bf16.mxu1 %vm787_vm0, %v786_v0 }
 0x1b3   :  { %607 = vmatprep.subr.bf16.mxu1 %v786_v0 }
 0x1b6   :  { %608 = vmatpush3.bf16.msra.mxu1 %v892_v2 }
 0x1b7   :  { %609 = vmatprep.subr.bf16.mxu1 %v786_v0 }
 0x1ba   :  { %610 = vmatpush3.bf16.msra.mxu1 %v898_v3 }
 0x1bb   :  { %611 = vmatprep.subr.bf16.mxu1 %v786_v0 }
 0x1be   :  { %612 = vmatpush3.bf16.msra.mxu1 %v904_v4 }
 0x1bf   :  { %613 = vmatprep.subr.bf16.mxu1 %v786_v0 }
 0x1c2   :  { %614 = vmatpush3.bf16.msra.mxu1 %v910_v5 }
 0x1c3   :  { %615 = vmatprep.subr.bf16.mxu1 %v786_v0 }
 0x1c6   :  { %616 = vmatpush3.bf16.msra.mxu1 %v920_v8 }
 0x1c7   :  { %617 = vmatprep.subr.bf16.mxu1 %v786_v0 }
 0x1ca   :  { %618 = vmatpush3.bf16.msra.mxu1 %v926_v10 }
 0x1cb   :  { %619 = vmatprep.subr.bf16.mxu1 %v786_v0 }
 0x1ce   :  { %620 = vmatpush3.bf16.msra.mxu1 %v933_v12 }
 0x1d1   :  { %622 = vmatmul.mubr.bf16.vlgmr.msra.gmra.mrb[0].mxu1 %v272_v30 }
 0x2a4   :  { %v387_v31 = vpop.f32.mrb[0].mxu1 }
 0x2a5   :  { %v394_v32 = vmul.f32 0.032258064, %v387_v31  ;;  %v623_v33 = vpop.f32.mrb[1].mxu1 }
 0x2a6   :  { %v390_v34 = vpop.f32.mrb[2].mxu1 }
 0x2a7   :  { %658 = vrsqrt.f32 %v394_v32  ;;  %v624_v35 = vpop.f32.mrb[3].mxu1  ;;  %vm397_vm1 = vcmp.eq.f32.partialorder %v394_v32, inf  ;;  %v400_v38 = vand.u32 2147483648, %v394_v32  ;;  %vm399_vm2 = vcmp.eq.f32.partialorder %v394_v32, 0.0 }
 0x2b1   :  { %v659_v36 = vpop.eup %658 }
 0x2b2   :  { %v396_v37 = vmul.f32 %v659_v36, %v394_v32 }
 0x2b4   :  { %v398_v39 = vsel %vm397_vm1, %v394_v32, %v396_v37 }
 0x2b5   :  { %v401_v40 = vsel %vm399_vm2, %v400_v38, %v398_v39 }
 0x2b6   :  { %v402_v41 = vadd.f32 1e-06, %v401_v40 }
 0x2b8   :  { %660 = vrcp.f32 %v402_v41 }
 0x2c2   :  { %v661_v42 = vpop.eup %660 }
 0x2c3   :  { %v406_v44 = vmul.f32 %v661_v42, %v978_v21 }
 0x2c5   :  { %v413_v46 = vmul.f32 %v449_v43, %v406_v44 }
 0x2c7   :  { %v420_v47 = vadd.f32 %v450_v45, %v413_v46 }
 0x2c9   :  { %421 = vst [vmem:[#allocation10] sm:$0xff] %v420_v47 }
 0x2ca   :  { %426 = vsyncadd [#allocation4], 64  ;;  %s788_s3 = smov [#allocation10]  }
 0x2cb   :  { %s427_s14 = sshll.u32 %s788_s3, 4  ;;  %s428_s14 = int_to_ptr.vmem [resolvable:$true] %s427_s14 }
 0x2cc   :  { %s750_s15 = scalar_lea.vmem %s428_s14, 64  ;;  %s754_s16 = scalar_lea.vmem %s428_s14, 128 }
 0x2cd   :  { %p751_p4 = scmp.ne.s32.totalorder %s428_s14, %s750_s15  ;;  %p755_p5 = scmp.lt.s32.totalorder %s428_s14, %s428_s14 }
 0x2ce   :  { %p756_p6 = scmp.lt.s32.totalorder %s754_s16, %s750_s15 }
 0x2d0   :  { %p757_p7 = por %p756_p6, %p755_p5 }
 0x2d2   :  { %p758_p8 = pnand %p757_p7, %p751_p4 }
 0x2d4   :  { %761 = shalt.err (!%p758_p8)
}
 0x2d5   :  { %s762_s20 = scalar_lea.hbm %s1037_s4, 64 }
 0x2d6   :  { %p763_p9 = scmp.ne.s32.totalorder %s1037_s4, %s762_s20  ;;  %p766_p10 = scmp.lt.u32.totalorder %s762_s20, %s1037_s4 }
 0x2d8   :  { %p768_p11 = pnand %p766_p10, %p763_p9 }
 0x2da   :  { %771 = shalt.err (!%p768_p11)
}
 0x2db   :  { %433 = dma.vmem_to_hbm [thread:$0]  %s428_s14, 64, %s1037_s4, [#allocation4], %s782_s12, %s782_s12, %s783_s13  }
 0x2dc   :  { %778 = dma.done.wait [#allocation4], 128  }
 0x2dd   :  { %779 = vsyncadd [#allocation4], 4294967168 }
 0x2de   :  { %437 = vsyncpa [#allocation3], 1 }
 0x2df   :  { %438 = vsyncpa [#allocation6], 1 }
 0x2e0   :  { %439 = vsyncpa [#allocation9], 1 }
 0x2e1   :  { %440 = vsyncpa [#allocation4], 1 }

</bundles_post_ra>
